<compile_context>
chip_gen: v6e
topology: v6e:2x2x1
jax: 0.10.0
libtpu: 0.0.40
codegen_flags: <defaults>
</compile_context>

<pallas_src>
import math
import functools
import numpy as np

import jax
import jax.numpy as jnp
from jax.experimental import pallas as pl
from jax.experimental.pallas import tpu as pltpu


_SCORE_PAD = 128   # lane-dense scores output width (D-1 = 7 padded up to 128)


# ----------------------------------------------------------------------------
# Pallas kernels: one fused timestep
#   refs (after the scalar-prefetch meta ref = [step, op_id0, op_id1]):
#     wex_ref (1, D, OH)     step's combined (W_embed @ Wx) block
#     wh_ref  (1, H, OH)     step's combined Wh block
#     b_ref   (1, 1, OH)     step's combined gate bias
#     wa_ref  (1, H, 128)    step's combined affine weight (zero-padded lanes)
#     ba_ref  (1, 1, 128)    step's combined affine bias   (zero-padded lanes)
#     h_ref   (N, H)         previous hidden state (aliased to next_h output)
#     c_ref   (N, H)         previous cell state   (LSTM only, aliased)
# ----------------------------------------------------------------------------
def _onehot_ops(meta_ref, n_rows, depth):
    """Row 0 = onehot(meta[1]), row 1 = onehot(meta[2]); shape (n_rows, depth)."""
    sub = jax.lax.broadcasted_iota(jnp.int32, (n_rows, depth), 0)
    lane = jax.lax.broadcasted_iota(jnp.int32, (n_rows, depth), 1)
    idx = jnp.where(sub == 0, meta_ref[1], meta_ref[2])      # (n_rows, depth)
    return (lane == idx).astype(jnp.float32)


def _masked_softmax_head(next_h, wa_ref, ba_ref, d_m1, scores_ref):
    """affine head + batch mean + softmax over the first d_m1 (valid) lanes."""
    y = jnp.dot(next_h, wa_ref[0], preferred_element_type=jnp.float32) + ba_ref[0]
    y_mean = jnp.mean(y, axis=0, keepdims=True)               # (1, 128)
    lane = jax.lax.broadcasted_iota(jnp.int32, y_mean.shape, 1)
    y_mask = jnp.where(lane < d_m1, y_mean, -1e30)            # pad -> -inf
    m = jnp.max(y_mask, axis=-1, keepdims=True)
    e = jnp.exp(y_mask - m)
    denom = jnp.sum(e, axis=-1, keepdims=True)
    # exact division (NOT approx reciprocal): p_tau / log_p_tau / loss consume
    # these values directly, so keep the softmax exact like the reference.
    scores_ref[...] = (e / denom).astype(scores_ref.dtype)


def _lstm_step_kernel(H, d_m1, meta_ref, wex_ref, wh_ref, b_ref, wa_ref, ba_ref,
                      h_ref, c_ref, next_h_ref, next_c_ref, scores_ref):
    n = h_ref.shape[0]
    d = wex_ref.shape[1]
    onehot = _onehot_ops(meta_ref, n, d)                      # (N, D)
    prev_h = h_ref[...]
    prev_c = c_ref[...]

    # embedding folded into the gate matmul: x @ Wx == onehot @ (We @ Wx)
    gates = (jnp.dot(onehot, wex_ref[0], preferred_element_type=jnp.float32)
             + jnp.dot(prev_h, wh_ref[0], preferred_element_type=jnp.float32)
             + b_ref[0])                                      # (N, 4H)

    # one full-slab sigmoid + one full-slab tanh; lane-select the g gate
    lane = jax.lax.broadcasted_iota(jnp.int32, gates.shape, 1)
    act = jnp.where(lane < 3 * H, jax.nn.sigmoid(gates), jnp.tanh(gates))
    it = act[:, 0 * H:1 * H]
    ft = act[:, 1 * H:2 * H]
    ot = act[:, 2 * H:3 * H]
    gt = act[:, 3 * H:4 * H]
    next_c = ft * prev_c + it * gt
    next_h = ot * jnp.tanh(next_c)
    next_c_ref[...] = next_c.astype(next_c_ref.dtype)
    next_h_ref[...] = next_h.astype(next_h_ref.dtype)

    _masked_softmax_head(next_h, wa_ref, ba_ref, d_m1, scores_ref)


def _rnn_step_kernel(d_m1, meta_ref, wex_ref, wh_ref, b_ref, wa_ref, ba_ref,
                     h_ref, next_h_ref, scores_ref):
    n = h_ref.shape[0]
    d = wex_ref.shape[1]
    onehot = _onehot_ops(meta_ref, n, d)                      # (N, D)
    prev_h = h_ref[...]

    pre = (jnp.dot(onehot, wex_ref[0], preferred_element_type=jnp.float32)
           + jnp.dot(prev_h, wh_ref[0], preferred_element_type=jnp.float32)
           + b_ref[0])                                        # (N, H)
    next_h = jnp.tanh(pre)
    next_h_ref[...] = next_h.astype(next_h_ref.dtype)

    _masked_softmax_head(next_h, wa_ref, ba_ref, d_m1, scores_ref)


# ----------------------------------------------------------------------------
# Host-side symbolic-tree helpers (mirrors the PyTorch reference)
# ----------------------------------------------------------------------------
class BinaryNode:
    def __init__(self, op):
        self.op = int(op)
        self.left = None
        self.right = None
        self.idx = None
        self.constant_index = None
        self.scores = None


class Agraph:
    def __init__(self):
        self.root = None
        self.constant_count = 0
        self.p_tau = None
        self.preorder = None


def is_leaf(symbolic_op):
    if symbolic_op == 'c' or symbolic_op == 'x':
        return (True, symbolic_op == 'c')
    return (False, False)


def is_constant(symbolic_op, agraph, node):
    if symbolic_op == 'c':
        agraph.constant_count += 1
        node.constant_index = agraph.constant_count - 1
        return True
    return False


def sampling(op_array, op_count, maximum_op, scores, idx_to_op):
    if op_count < maximum_op:
        op = int(np.random.choice(op_array, p=scores))
    else:
        isleaf, _ = is_leaf('+')
        op = None
        while isleaf is not True:
            op = int(np.random.choice(op_array, p=scores))
            symbolic_op = idx_to_op[op]
            isleaf, _ = is_leaf(symbolic_op)
    return op


def _combine_adjacent(blocks):
    # step 0 keeps its own slice; step i>0 = slice i + slice i-1
    # (matches the reference's i==0 branch vs. W[:, i] + W[:, i-1] combine)
    return blocks.at[1:].add(blocks[:-1])


# ----------------------------------------------------------------------------
# SymbolicRNN (JAX / Pallas version)
# ----------------------------------------------------------------------------
class SymbolicRNNPallas:
    def __init__(self, idx_to_op, op_to_idx, X, y, method, maxiter, threshold,
                 operator_size, embeded_size, hidden_size, key):
        self.maxiter = maxiter
        self.threshold = threshold
        self.method = method
        self.idx_to_op = idx_to_op
        self.op_to_idx = op_to_idx
        self.X, self.y = X, y
        self.D = operator_size
        self.E = embeded_size
        self.H = hidden_size
        order = 4 if method == 'LSTM' else 1
        self.order = order

        D, E, H, P = operator_size, embeded_size, hidden_size, _SCORE_PAD
        OH = order * H

        k1, k2, k3, k4 = jax.random.split(key, 4)
        # raw parameters (same layout / init scaling as the PyTorch module)
        self.Wx = jax.random.normal(k1, (E, maxiter * OH), jnp.float32) / math.sqrt(H)
        self.b = jnp.zeros((maxiter * OH,), jnp.float32)
        self.Wh = jax.random.normal(k2, (H, maxiter * OH), jnp.float32) / math.sqrt(H)
        self.W_embed = jax.random.normal(k3, (D, maxiter * E), jnp.float32) / math.sqrt(D)
        self.W_affine = (jax.random.normal(k4, (H, maxiter * (D - 1)), jnp.float32)
                         / math.sqrt(H))
        self.b_affine = jnp.zeros((maxiter * (D - 1),), jnp.float32)

        # ---- precomputed per-step combined weights (one-time, device-side) ----
        def split2d(W, width):   # (rows, maxiter*width) -> (maxiter, rows, width)
            return jnp.transpose(W.reshape(W.shape[0], maxiter, width), (1, 0, 2))

        def split1d(v, width):   # (maxiter*width,) -> (maxiter, 1, width)
            return v.reshape(maxiter, 1, width)

        We_steps = _combine_adjacent(split2d(self.W_embed, E))        # (T, D, E)
        Wx_steps = _combine_adjacent(split2d(self.Wx, OH))            # (T, E, OH)
        Wh_steps = _combine_adjacent(split2d(self.Wh, OH))            # (T, H, OH)
        b_steps = _combine_adjacent(split1d(self.b, OH))              # (T, 1, OH)
        Wa_steps = _combine_adjacent(split2d(self.W_affine, D - 1))   # (T, H, D-1)
        ba_steps = _combine_adjacent(split1d(self.b_affine, D - 1))   # (T, 1, D-1)

        # fold the embedding lookup into the gate matmul:
        #   x @ Wx == (onehot @ We) @ Wx == onehot @ (We @ Wx)
        self.W_ex_steps = jnp.einsum('tde,teo->tdo', We_steps, Wx_steps)  # (T, D, OH)
        self.Wh_steps = Wh_steps
        self.b_steps = b_steps
        # zero-pad the affine head to a lane-dense 128-wide output slab
        self.W_affine_steps = jnp.pad(Wa_steps, ((0, 0), (0, 0), (0, P - (D - 1))))
        self.b_affine_steps = jnp.pad(ba_steps, ((0, 0), (0, 0), (0, P - (D - 1))))

        # one jitted pallas_call used for every timestep (compiled once)
        self._step_fn = self._build_step_call()

    # ------------------------------------------------------------------
    def _build_step_call(self):
        N, D, H, P = 2, self.D, self.H, _SCORE_PAD
        OH = self.order * H
        d_m1 = D - 1
        is_lstm = (self.method == 'LSTM')

        # index maps receive (grid_idx, meta_smem_ref); meta[0] is the step id.
        step_map = lambda g, meta: (meta[0], 0, 0)
        state_map = lambda g, meta: (0, 0)

        in_specs = [
            pl.BlockSpec((1, D, OH), step_map),    # W_ex_steps ([We @ Wx] fold)
            pl.BlockSpec((1, H, OH), step_map),    # Wh_steps
            pl.BlockSpec((1, 1, OH), step_map),    # b_steps
            pl.BlockSpec((1, H, P), step_map),     # W_affine_steps (padded)
            pl.BlockSpec((1, 1, P), step_map),     # b_affine_steps (padded)
            pl.BlockSpec((N, H), state_map),       # prev_h
        ]
        # alias indices count ALL positional operands incl. the scalar-prefetch
        # meta arg: (meta=0, wex=1, wh=2, b=3, wa=4, ba=5, prev_h=6, prev_c=7)
        if is_lstm:
            in_specs.append(pl.BlockSpec((N, H), state_map))   # prev_c
            out_specs = (pl.BlockSpec((N, H), state_map),
                         pl.BlockSpec((N, H), state_map),
                         pl.BlockSpec((1, P), state_map))
            out_shape = (jax.ShapeDtypeStruct((N, H), jnp.float32),
                         jax.ShapeDtypeStruct((N, H), jnp.float32),
                         jax.ShapeDtypeStruct((1, P), jnp.float32))
            kernel = functools.partial(_lstm_step_kernel, H, d_m1)
            aliases = {6: 0, 7: 1}     # prev_h -> next_h, prev_c -> next_c
            donate = (6, 7)
        else:
            out_specs = (pl.BlockSpec((N, H), state_map),
                         pl.BlockSpec((1, P), state_map))
            out_shape = (jax.ShapeDtypeStruct((N, H), jnp.float32),
                         jax.ShapeDtypeStruct((1, P), jnp.float32))
            kernel = functools.partial(_rnn_step_kernel, d_m1)
            aliases = {6: 0}           # prev_h -> next_h
            donate = (6,)

        call = pl.pallas_call(
            kernel,
            grid_spec=pltpu.PrefetchScalarGridSpec(
                num_scalar_prefetch=1,          # meta = [step, op_id0, op_id1]
                grid=(1,),
                in_specs=in_specs,
                out_specs=out_specs,
            ),
            out_shape=out_shape,
            input_output_aliases=aliases,
            compiler_params=pltpu.CompilerParams(
                dimension_semantics=("arbitrary",)),
        )
        # donate the recurrent state so XLA truly aliases the buffers
        return jax.jit(call, donate_argnums=donate)

    # ------------------------------------------------------------------
    def forward(self):
        maxiter = self.maxiter
        maxiter_array = [x for x in range(100) if x % 2 == 1]
        maximum_op = maxiter_array.index(maxiter)
        agraph = Agraph()
        N, D, H = 2, self.D, self.H
        op_count = 0
        preorder, node_array = [], []

        x0 = np.array([0, 0], dtype=np.int32)
        prev_h = jnp.zeros((N, H), jnp.float32)
        prev_c = jnp.zeros((N, H), jnp.float32)

        p_tau_list = []
        selected_op = []
        for i in range(maxiter):
            meta = np.array([i, int(x0[0]), int(x0[1])], dtype=np.int32)
            if self.method == 'LSTM':
                prev_h, prev_c, scores_pad = self._step_fn(
                    meta, self.W_ex_steps, self.Wh_steps, self.b_steps,
                    self.W_affine_steps, self.b_affine_steps, prev_h, prev_c)
            else:
                prev_h, scores_pad = self._step_fn(
                    meta, self.W_ex_steps, self.Wh_steps, self.b_steps,
                    self.W_affine_steps, self.b_affine_steps, prev_h)

            # device -> host sync is required here: sampling drives the next
            # step's operator ids (same as .detach().cpu().numpy() in torch).
            scores_flat = np.asarray(scores_pad)[0, :D - 1]       # (D-1,) float32
            scores_np = scores_flat.astype(np.float64)
            scores_np /= scores_np.sum()
            op_array = np.arange(1, len(self.idx_to_op))

            if op_count < maximum_op:
                op = int(np.random.choice(op_array, p=scores_np))
            else:
                scores_np[self.op_to_idx['+'] - 1] = 0
                scores_np[self.op_to_idx['-'] - 1] = 0
                scores_np[self.op_to_idx['*'] - 1] = 0
                scores_np[self.op_to_idx['/'] - 1] = 0
                scores_np /= np.sum(scores_np)
                op = sampling(op_array, op_count, maximum_op, scores_np, self.idx_to_op)
            if i == 0:
                scores_np[self.op_to_idx['c'] - 1] = 0
                scores_np[self.op_to_idx['x'] - 1] = 0
                scores_np /= np.sum(scores_np)
                op = sampling(op_array, op_count, maximum_op, scores_np, self.idx_to_op)

            prev_node = preorder[-1] if len(preorder) != 0 else None
            symbolic_op = self.idx_to_op[op]
            _, is_con_flag = is_leaf(symbolic_op)
            if is_con_flag and prev_node is not None:
                if prev_node.left is not None:
                    if self.idx_to_op[prev_node.left.op] == 'c':
                        scores_np[self.op_to_idx['c'] - 1] = 0
                        scores_np /= np.sum(scores_np)
                        op = sampling(op_array, op_count, maximum_op, scores_np,
                                      self.idx_to_op)
                        symbolic_op = self.idx_to_op[op]

            leaf_flag, _ = is_leaf(symbolic_op)
            if leaf_flag is False:
                op_count += 1
            cur_node = BinaryNode(op)
            cur_node.idx = i
            is_constant(symbolic_op, agraph, cur_node)
            cur_node.scores = scores_flat
            node_array.append(cur_node)

            if i == 0:
                agraph.root = cur_node
                x0 = np.array([op, 0], dtype=np.int32)
                preorder.append(cur_node)
            else:
                if prev_node.left is None:
                    prev_node.left = cur_node
                else:
                    prev_node.right = cur_node
                    preorder.pop()
                if leaf_flag:
                    x0 = np.array([prev_node.op, prev_node.left.op], dtype=np.int32)
                else:
                    x0 = np.array([op, 0], dtype=np.int32)
                    preorder.append(cur_node)

            p_tau_list.append(float(scores_flat[op - 1]))
            selected_op.append(op)
            if len(preorder) == 0:
                break

        p_tau = jnp.asarray(np.asarray(p_tau_list, dtype=np.float32))
        log_p_tau_array = jnp.log(p_tau)
        agraph.p_tau = p_tau
        agraph.preorder = jnp.asarray(selected_op, jnp.float32)

        # TODO(synk): localOptimizer / defineAgraph / reward are not defined in
        # the reference source; use a placeholder reward of 1.0 per node.
        reward_array = np.ones(len(selected_op), dtype=np.float32)
        R_y = 1.0

        scale = np.where(reward_array >= self.threshold,
                         np.float32(1.0), np.float32(0.1)).astype(np.float32)
        loss = jnp.mean(log_p_tau_array * jnp.asarray(reward_array * scale))
        cost = jnp.mean(p_tau * jnp.asarray(reward_array))
        return agraph, loss, R_y, cost


# ----------------------------------------------------------------------------
if __name__ == "__main__":
    idx_to_op = {0: '<pad>', 1: '+', 2: '-', 3: '*', 4: '/', 5: 'sin',
                 6: 'c', 7: 'x'}
    op_to_idx = {v: k for k, v in idx_to_op.items()}
    operator_size = len(idx_to_op)      # D = 8  -> scores have D-1 = 7 entries
    maxiter = 5                         # must be odd (maxiter_array)
    embeded_size = 16
    hidden_size = 32
    threshold = 0.5

    key = jax.random.PRNGKey(0)
    kx, ky, kp, kp2 = jax.random.split(key, 4)
    X = jax.random.normal(kx, (8, 1), jnp.float32)
    y = jax.random.normal(ky, (8,), jnp.float32)

    # LSTM path
    np.random.seed(0)  # deterministic host-side op sampling
    model = SymbolicRNNPallas(idx_to_op, op_to_idx, X, y, 'LSTM', maxiter,
                              threshold, operator_size, embeded_size,
                              hidden_size, kp)
    agraph, loss, R_y, cost = model.forward()
    jax.block_until_ready((loss, cost, agraph.p_tau))

    # RNN path (exercises the non-LSTM kernel)
    np.random.seed(1)
    model_rnn = SymbolicRNNPallas(idx_to_op, op_to_idx, X, y, 'RNN', maxiter,
                                  threshold, operator_size, embeded_size,
                                  hidden_size, kp2)
    agraph2, loss2, R_y2, cost2 = model_rnn.forward()
    jax.block_until_ready((loss2, cost2, agraph2.p_tau))

    print("KERNEL_OK")
</pallas_src>

<mosaic_0001>
module attributes {stable_mosaic.version = 11 : i64} {
  func.func @_lstm_step_kernel(%arg0: i32, %arg1: memref<3xi32, #tpu.memory_space<smem>>, %arg2: memref<1x8x128xf32, #tpu.memory_space<vmem>>, %arg3: memref<1x32x128xf32, #tpu.memory_space<vmem>>, %arg4: memref<1x1x128xf32, #tpu.memory_space<vmem>>, %arg5: memref<1x32x128xf32, #tpu.memory_space<vmem>>, %arg6: memref<1x1x128xf32, #tpu.memory_space<vmem>>, %arg7: memref<2x32xf32, #tpu.memory_space<vmem>>, %arg8: memref<2x32xf32, #tpu.memory_space<vmem>>, %arg9: memref<2x32xf32, #tpu.memory_space<vmem>>, %arg10: memref<2x32xf32, #tpu.memory_space<vmem>>, %arg11: memref<1x128xf32, #tpu.memory_space<vmem>>) attributes {dimension_semantics = [#tpu.dimension_semantics<arbitrary>], iteration_bounds = array<i64: 1>, scalar_prefetch = 1 : i64, scratch_operands = 0 : i64, tpu.core_type = #tpu.core_type<tc>, window_params = [{transform_indices = @transform_0, window_bounds = array<i64: 1, 8, 128>}, {transform_indices = @transform_1, window_bounds = array<i64: 1, 32, 128>}, {transform_indices = @transform_2, window_bounds = array<i64: 1, 1, 128>}, {transform_indices = @transform_3, window_bounds = array<i64: 1, 32, 128>}, {transform_indices = @transform_4, window_bounds = array<i64: 1, 1, 128>}, {pipeline_mode = #tpu.pipeline_mode<synchronous>, transform_indices = @transform_5, window_bounds = array<i64: 2, 32>}, {pipeline_mode = #tpu.pipeline_mode<synchronous>, transform_indices = @transform_6, window_bounds = array<i64: 2, 32>}, {pipeline_mode = #tpu.pipeline_mode<synchronous>, transform_indices = @transform_7, window_bounds = array<i64: 2, 32>}, {pipeline_mode = #tpu.pipeline_mode<synchronous>, transform_indices = @transform_8, window_bounds = array<i64: 2, 32>}, {pipeline_mode = #tpu.pipeline_mode<synchronous>, transform_indices = @transform_9, window_bounds = array<i64: 1, 128>}]} {
    %0 = tpu.iota {dimensions = array<i32: 0>} : vector<2x8xi32>
    %1 = tpu.iota {dimensions = array<i32: 1>} : vector<2x8xi32>
    %c0_i32 = arith.constant 0 : i32
    %2 = vector.broadcast %c0_i32 : i32 to vector<2x8xi32>
    %3 = arith.cmpi eq, %0, %2 : vector<2x8xi32>
    %c1 = arith.constant 1 : index
    %4 = memref.load %arg1[%c1] : memref<3xi32, #tpu.memory_space<smem>>
    %c2 = arith.constant 2 : index
    %5 = memref.load %arg1[%c2] : memref<3xi32, #tpu.memory_space<smem>>
    %6 = vector.broadcast %4 : i32 to vector<2x8xi32>
    %7 = vector.broadcast %5 : i32 to vector<2x8xi32>
    %8 = arith.select %3, %6, %7 : vector<2x8xi1>, vector<2x8xi32>
    %9 = arith.cmpi eq, %1, %8 : vector<2x8xi32>
    %10 = arith.extui %9 : vector<2x8xi1> to vector<2x8xi32>
    %11 = arith.sitofp %10 : vector<2x8xi32> to vector<2x8xf32>
    %c0 = arith.constant 0 : index
    %c0_0 = arith.constant 0 : index
    %12 = vector.load %arg7[%c0, %c0_0] : memref<2x32xf32, #tpu.memory_space<vmem>>, vector<2x32xf32>
    %c0_1 = arith.constant 0 : index
    %c0_2 = arith.constant 0 : index
    %13 = vector.load %arg8[%c0_1, %c0_2] : memref<2x32xf32, #tpu.memory_space<vmem>>, vector<2x32xf32>
    %c0_3 = arith.constant 0 : index
    %c0_4 = arith.constant 0 : index
    %c0_5 = arith.constant 0 : index
    %14 = vector.load %arg2[%c0_3, %c0_4, %c0_5] : memref<1x8x128xf32, #tpu.memory_space<vmem>>, vector<1x8x128xf32>
    %15 = vector.shape_cast %14 : vector<1x8x128xf32> to vector<8x128xf32>
    %cst = arith.constant dense<0.000000e+00> : vector<2x128xf32>
    %16 = tpu.matmul %11, %15, %cst {dimension_numbers = #tpu.dot_dimension_numbers<[1], [0], [0], [1], [0, 0, 1, 1], [], []>} : vector<2x8xf32>, vector<8x128xf32>, vector<2x128xf32> -> vector<2x128xf32>
    %c0_6 = arith.constant 0 : index
    %c0_7 = arith.constant 0 : index
    %c0_8 = arith.constant 0 : index
    %17 = vector.load %arg3[%c0_6, %c0_7, %c0_8] : memref<1x32x128xf32, #tpu.memory_space<vmem>>, vector<1x32x128xf32>
    %18 = vector.shape_cast %17 : vector<1x32x128xf32> to vector<32x128xf32>
    %cst_9 = arith.constant dense<0.000000e+00> : vector<2x128xf32>
    %19 = tpu.matmul %12, %18, %cst_9 {dimension_numbers = #tpu.dot_dimension_numbers<[1], [0], [0], [1], [0, 0, 1, 1], [], []>} : vector<2x32xf32>, vector<32x128xf32>, vector<2x128xf32> -> vector<2x128xf32>
    %20 = arith.addf %16, %19 : vector<2x128xf32>
    %c0_10 = arith.constant 0 : index
    %c0_11 = arith.constant 0 : index
    %c0_12 = arith.constant 0 : index
    %21 = vector.load %arg4[%c0_10, %c0_11, %c0_12] : memref<1x1x128xf32, #tpu.memory_space<vmem>>, vector<1x1x128xf32>
    %22 = vector.shape_cast %21 : vector<1x1x128xf32> to vector<1x128xf32>
    %23 = vector.broadcast %22 : vector<1x128xf32> to vector<2x128xf32>
    %24 = arith.addf %20, %23 : vector<2x128xf32>
    %25 = tpu.iota {dimensions = array<i32: 1>} : vector<2x128xi32>
    %c96_i32 = arith.constant 96 : i32
    %26 = vector.broadcast %c96_i32 : i32 to vector<2x128xi32>
    %27 = arith.cmpi slt, %25, %26 : vector<2x128xi32>
    %28 = arith.negf %24 : vector<2x128xf32>
    %29 = math.exp %28 : vector<2x128xf32>
    %cst_13 = arith.constant 1.000000e+00 : f32
    %30 = vector.broadcast %cst_13 : f32 to vector<2x128xf32>
    %31 = arith.addf %30, %29 : vector<2x128xf32>
    %32 = arith.divf %30, %31 : vector<2x128xf32>
    %33 = math.tanh %24 : vector<2x128xf32>
    %34 = arith.select %27, %32, %33 : vector<2x128xi1>, vector<2x128xf32>
    %35 = vector.extract_strided_slice %34 {offsets = [0, 0], sizes = [2, 32], strides = [1, 1]} : vector<2x128xf32> to vector<2x32xf32>
    %36 = vector.extract_strided_slice %34 {offsets = [0, 32], sizes = [2, 32], strides = [1, 1]} : vector<2x128xf32> to vector<2x32xf32>
    %37 = vector.extract_strided_slice %34 {offsets = [0, 64], sizes = [2, 32], strides = [1, 1]} : vector<2x128xf32> to vector<2x32xf32>
    %38 = vector.extract_strided_slice %34 {offsets = [0, 96], sizes = [2, 32], strides = [1, 1]} : vector<2x128xf32> to vector<2x32xf32>
    %39 = arith.mulf %36, %13 : vector<2x32xf32>
    %40 = arith.mulf %35, %38 : vector<2x32xf32>
    %41 = arith.addf %39, %40 : vector<2x32xf32>
    %42 = math.tanh %41 : vector<2x32xf32>
    %43 = arith.mulf %37, %42 : vector<2x32xf32>
    %c0_14 = arith.constant 0 : index
    %c0_15 = arith.constant 0 : index
    %44 = vector.load %arg10[%c0_14, %c0_15] : memref<2x32xf32, #tpu.memory_space<vmem>>, vector<2x32xf32>
    tpu.vector_store %arg10[%c0_14, %c0_15], %41 {strides = array<i32>} : memref<2x32xf32, #tpu.memory_space<vmem>>, vector<2x32xf32>,
    %c0_16 = arith.constant 0 : index
    %c0_17 = arith.constant 0 : index
    %45 = vector.load %arg9[%c0_16, %c0_17] : memref<2x32xf32, #tpu.memory_space<vmem>>, vector<2x32xf32>
    tpu.vector_store %arg9[%c0_16, %c0_17], %43 {strides = array<i32>} : memref<2x32xf32, #tpu.memory_space<vmem>>, vector<2x32xf32>,
    %c0_18 = arith.constant 0 : index
    %c0_19 = arith.constant 0 : index
    %c0_20 = arith.constant 0 : index
    %46 = vector.load %arg5[%c0_18, %c0_19, %c0_20] : memref<1x32x128xf32, #tpu.memory_space<vmem>>, vector<1x32x128xf32>
    %47 = vector.shape_cast %46 : vector<1x32x128xf32> to vector<32x128xf32>
    %cst_21 = arith.constant dense<0.000000e+00> : vector<2x128xf32>
    %48 = tpu.matmul %43, %47, %cst_21 {dimension_numbers = #tpu.dot_dimension_numbers<[1], [0], [0], [1], [0, 0, 1, 1], [], []>} : vector<2x32xf32>, vector<32x128xf32>, vector<2x128xf32> -> vector<2x128xf32>
    %c0_22 = arith.constant 0 : index
    %c0_23 = arith.constant 0 : index
    %c0_24 = arith.constant 0 : index
    %49 = vector.load %arg6[%c0_22, %c0_23, %c0_24] : memref<1x1x128xf32, #tpu.memory_space<vmem>>, vector<1x1x128xf32>
    %50 = vector.shape_cast %49 : vector<1x1x128xf32> to vector<1x128xf32>
    %51 = vector.broadcast %50 : vector<1x128xf32> to vector<2x128xf32>
    %52 = arith.addf %48, %51 : vector<2x128xf32>
    %cst_25 = arith.constant dense<0.000000e+00> : vector<128xf32>
    %53 = vector.multi_reduction <add>, %52, %cst_25 [0] : vector<2x128xf32> to vector<128xf32>
    %54 = vector.shape_cast %53 : vector<128xf32> to vector<1x128xf32>
    %cst_26 = arith.constant 2.000000e+00 : f32
    %55 = vector.broadcast %cst_26 : f32 to vector<1x128xf32>
    %56 = arith.divf %54, %55 : vector<1x128xf32>
    %57 = tpu.iota {dimensions = array<i32: 1>} : vector<1x128xi32>
    %c7_i32 = arith.constant 7 : i32
    %58 = vector.broadcast %c7_i32 : i32 to vector<1x128xi32>
    %59 = arith.cmpi slt, %57, %58 : vector<1x128xi32>
    %cst_27 = arith.constant -1.000000e+30 : f32
    %60 = vector.broadcast %cst_27 : f32 to vector<1x128xf32>
    %61 = arith.select %59, %56, %60 : vector<1x128xi1>, vector<1x128xf32>
    %cst_28 = arith.constant dense<0xFF800000> : vector<1xf32>
    %62 = vector.multi_reduction <maximumf>, %61, %cst_28 [1] : vector<1x128xf32> to vector<1xf32>
    %63 = vector.shape_cast %62 : vector<1xf32> to vector<1x1xf32>
    %64 = vector.broadcast %63 : vector<1x1xf32> to vector<1x128xf32>
    %65 = arith.subf %61, %64 : vector<1x128xf32>
    %66 = math.exp %65 : vector<1x128xf32>
    %cst_29 = arith.constant dense<0.000000e+00> : vector<1xf32>
    %67 = vector.multi_reduction <add>, %66, %cst_29 [1] : vector<1x128xf32> to vector<1xf32>
    %68 = vector.shape_cast %67 : vector<1xf32> to vector<1x1xf32>
    %69 = vector.broadcast %68 : vector<1x1xf32> to vector<1x128xf32>
    %70 = arith.divf %66, %69 : vector<1x128xf32>
    %c0_30 = arith.constant 0 : index
    %c0_31 = arith.constant 0 : index
    %71 = vector.load %arg11[%c0_30, %c0_31] : memref<1x128xf32, #tpu.memory_space<vmem>>, vector<1x128xf32>
    tpu.vector_store %arg11[%c0_30, %c0_31], %70 {strides = array<i32>} : memref<1x128xf32, #tpu.memory_space<vmem>>, vector<1x128xf32>,
    return
  }
  func.func @transform_0(%arg0: i32, %arg1: memref<3xi32, #tpu.memory_space<smem>>) -> (i32, i32, i32) {
    %c0 = arith.constant 0 : index
    %0 = memref.load %arg1[%c0] : memref<3xi32, #tpu.memory_space<smem>>
    %c0_i32 = arith.constant 0 : i32
    %c0_i32_0 = arith.constant 0 : i32
    %c0_i32_1 = arith.constant 0 : i32
    return %0, %c0_i32, %c0_i32_0 : i32, i32, i32
  }
  func.func @transform_1(%arg0: i32, %arg1: memref<3xi32, #tpu.memory_space<smem>>) -> (i32, i32, i32) {
    %c0 = arith.constant 0 : index
    %0 = memref.load %arg1[%c0] : memref<3xi32, #tpu.memory_space<smem>>
    %c0_i32 = arith.constant 0 : i32
    %c0_i32_0 = arith.constant 0 : i32
    %c0_i32_1 = arith.constant 0 : i32
    return %0, %c0_i32, %c0_i32_0 : i32, i32, i32
  }
  func.func @transform_2(%arg0: i32, %arg1: memref<3xi32, #tpu.memory_space<smem>>) -> (i32, i32, i32) {
    %c0 = arith.constant 0 : index
    %0 = memref.load %arg1[%c0] : memref<3xi32, #tpu.memory_space<smem>>
    %c0_i32 = arith.constant 0 : i32
    %c0_i32_0 = arith.constant 0 : i32
    %c0_i32_1 = arith.constant 0 : i32
    return %0, %c0_i32, %c0_i32_0 : i32, i32, i32
  }
  func.func @transform_3(%arg0: i32, %arg1: memref<3xi32, #tpu.memory_space<smem>>) -> (i32, i32, i32) {
    %c0 = arith.constant 0 : index
    %0 = memref.load %arg1[%c0] : memref<3xi32, #tpu.memory_space<smem>>
    %c0_i32 = arith.constant 0 : i32
    %c0_i32_0 = arith.constant 0 : i32
    %c0_i32_1 = arith.constant 0 : i32
    return %0, %c0_i32, %c0_i32_0 : i32, i32, i32
  }
  func.func @transform_4(%arg0: i32, %arg1: memref<3xi32, #tpu.memory_space<smem>>) -> (i32, i32, i32) {
    %c0 = arith.constant 0 : index
    %0 = memref.load %arg1[%c0] : memref<3xi32, #tpu.memory_space<smem>>
    %c0_i32 = arith.constant 0 : i32
    %c0_i32_0 = arith.constant 0 : i32
    %c0_i32_1 = arith.constant 0 : i32
    return %0, %c0_i32, %c0_i32_0 : i32, i32, i32
  }
  func.func @transform_5(%arg0: i32, %arg1: memref<3xi32, #tpu.memory_space<smem>>) -> (i32, i32) {
    %c0_i32 = arith.constant 0 : i32
    %c0_i32_0 = arith.constant 0 : i32
    %c0_i32_1 = arith.constant 0 : i32
    return %c0_i32, %c0_i32_0 : i32, i32
  }
  func.func @transform_6(%arg0: i32, %arg1: memref<3xi32, #tpu.memory_space<smem>>) -> (i32, i32) {
    %c0_i32 = arith.constant 0 : i32
    %c0_i32_0 = arith.constant 0 : i32
    %c0_i32_1 = arith.constant 0 : i32
    return %c0_i32, %c0_i32_0 : i32, i32
  }
  func.func @transform_7(%arg0: i32, %arg1: memref<3xi32, #tpu.memory_space<smem>>) -> (i32, i32) {
    %c0_i32 = arith.constant 0 : i32
    %c0_i32_0 = arith.constant 0 : i32
    %c0_i32_1 = arith.constant 0 : i32
    return %c0_i32, %c0_i32_0 : i32, i32
  }
  func.func @transform_8(%arg0: i32, %arg1: memref<3xi32, #tpu.memory_space<smem>>) -> (i32, i32) {
    %c0_i32 = arith.constant 0 : i32
    %c0_i32_0 = arith.constant 0 : i32
    %c0_i32_1 = arith.constant 0 : i32
    return %c0_i32, %c0_i32_0 : i32, i32
  }
  func.func @transform_9(%arg0: i32, %arg1: memref<3xi32, #tpu.memory_space<smem>>) -> (i32, i32) {
    %c0_i32 = arith.constant 0 : i32
    %c0_i32_0 = arith.constant 0 : i32
    %c0_i32_1 = arith.constant 0 : i32
    return %c0_i32, %c0_i32_0 : i32, i32
  }
}

</mosaic_0001>

<bundles_post_ra>
// kernel: tpu_custom_call.1
= control target key start
LH: loop header
LB: loop body
LE: loop exit
PB: predicated region body
PF: predicated region fallthrough
CT: control target
= control target key end

     0   :  { %s815_s13 = smov [#allocation3]   ;;  %s1018_s0 = inlined_call_operand.hbm [shape: s32[3], index: 0, kind: input, shape index: {}]   ;;  %s1019_s1 = inlined_call_operand.hbm [shape: f32[5,8,128], index: 1, kind: input, shape index: {}]   ;;  %s1020_s2 = inlined_call_operand.hbm [shape: f32[5,32,128], index: 2, kind: input, shape index: {}]   ;;  %s1021_s3 = inlined_call_operand.vmem [shape: f32[5,1,128], index: 3, kind: input, shape index: {}]   ;;  %s1022_s4 = inlined_call_operand.hbm [shape: f32[5,32,128], index: 4, kind: input, shape index: {}]   ;;  %s1023_s5 = inlined_call_operand.hbm [shape: f32[5,1,128], index: 5, kind: input, shape index: {}]   ;;  %s1024_s6 = inlined_call_operand.hbm [shape: f32[2,32], index: 6, kind: input, shape index: {}, may-alias: {6,8}]   ;;  %s1025_s7 = inlined_call_operand.hbm [shape: f32[2,32], index: 7, kind: input, shape index: {}, may-alias: {7,9}]   ;;  %s1026_s8 = inlined_call_operand.hbm [shape: f32[2,32], index: 8, kind: output, shape index: {0}, may-alias: {6,8}]   ;;  %s1027_s9 = inlined_call_operand.hbm [shape: f32[2,32], index: 9, kind: output, shape index: {1}, may-alias: {7,9}]   ;;  %s1028_s10 = inlined_call_operand.hbm [shape: f32[1,128], index: 10, kind: output, shape index: {2}]  }
   0x1   :  { %17 = dma.hbm_to_smem %s1018_s0, 16, %s815_s13, [#allocation2] }
   0x2   :  { %801 = dma.done.wait [#allocation2], 16 }
   0x3   :  { %802 = vsyncadd [#allocation2], 4294967280 }
   0x4   :  { %19 = sfence }
   0x5   :  { %20 = vsyncpa [#allocation5], 0 }
   0x6   :  { %21 = vsyncpa [#allocation8], 0 }
   0x7   :  { %22 = vsyncpa [#allocation11], 0 }
   0x8   :  { %23 = vsyncpa [#allocation14], 0 }
   0x9   :  { %24 = vsyncpa [#allocation6], 0  ;;  %s890_s16 = sld [smem:[#allocation3]] }
   0xa   :  { %25 = vsyncpa [#allocation17], 0  ;;  %s816_s17 = smov [#allocation7]   ;;  %s817_s19 = smov [#allocation10]  }
   0xb   :  { %s48_s18 = sshll.u32 %s816_s17, 4  ;;  %s87_s0 = sshll.u32 %s817_s19, 4  ;;  %s892_s18 = int_to_ptr.vmem [resolvable:$true] %s48_s18  ;;  %s894_s0 = int_to_ptr.vmem [resolvable:$true] %s87_s0 }
   0xc   :  { %s818_s20 = smov [#allocation4]   ;;  %s615_s13 = scalar_lea.hbm %s1020_s2, 2560 }
   0xd   :  { %s35_s21 = sshll.u32 %s818_s20, 4  ;;  %s896_s21 = int_to_ptr.vmem [resolvable:$true] %s35_s21 }
   0xf   :  { %s535_s22 = sshll.u32 %s890_s16, 9  ;;  %s525_s23 = sshll.u32 %s890_s16, 4 }
  0x10   :  { %s47_s26 = scalar_lea.hbm %s1020_s2, %s535_s22  ;;  %s908_s29 = scalar_lea.hbm %s1023_s5, %s525_s23 }
  0x11   :  { %s613_s30 = scalar_lea.hbm %s47_s26, 512  ;;  %p616_p1 = scmp.lt.s32.totalorder %s47_s26, %s1020_s2 }
  0x12   :  { %p614_p0 = scmp.ne.s32.totalorder %s47_s26, %s613_s30  ;;  %p617_p2 = scmp.lt.s32.totalorder %s615_s13, %s613_s30 }
  0x14   :  { %p618_p3 = por %p617_p2, %p616_p1 }
  0x16   :  { %p619_p4 = pnand %p618_p3, %p614_p0 }
  0x18   :  { %622 = shalt.err (!%p619_p4)
}
  0x19   :  { %s623_s17 = scalar_lea.vmem %s892_s18, 512  ;;  %p628_p6 = scmp.lt.s32.totalorder %s892_s18, %s892_s18 }
  0x1a   :  { %p624_p5 = scmp.ne.s32.totalorder %s892_s18, %s623_s17  ;;  %p629_p7 = scmp.lt.s32.totalorder %s623_s17, %s623_s17 }
  0x1c   :  { %p630_p8 = por %p629_p7, %p628_p6 }
  0x1e   :  { %p631_p9 = pnand %p630_p8, %p624_p5 }
  0x20   :  { %634 = shalt.err (!%p631_p9)
}
  0x21   :  { %s819_s19 = smov 128   ;;  %s820_s2 = smov 8  }
  0x22   :  { %54 = dma.hbm_to_vmem [thread:$0]  %s47_s26, 512, %s892_s18, [#allocation8], %s819_s19, %s819_s19, %s820_s2  }
  0x23   :  { %s635_s20 = scalar_lea.hbm %s908_s29, 16  ;;  %s637_s25 = scalar_lea.hbm %s1023_s5, 80 }
  0x24   :  { %p636_p10 = scmp.ne.s32.totalorder %s908_s29, %s635_s20  ;;  %p638_p11 = scmp.lt.s32.totalorder %s908_s29, %s1023_s5 }
  0x25   :  { %p639_p12 = scmp.lt.s32.totalorder %s637_s25, %s635_s20 }
  0x27   :  { %p640_p13 = por %p639_p12, %p638_p11 }
  0x29   :  { %p641_p0 = pnand %p640_p13, %p636_p10 }
  0x2b   :  { %644 = shalt.err (!%p641_p0)
}
  0x2c   :  { %s645_s30 = scalar_lea.vmem %s894_s0, 16  ;;  %s649_s18 = scalar_lea.vmem %s894_s0, 32 }
  0x2d   :  { %p646_p1 = scmp.ne.s32.totalorder %s894_s0, %s645_s30  ;;  %p650_p2 = scmp.lt.s32.totalorder %s894_s0, %s894_s0 }
  0x2e   :  { %p651_p3 = scmp.lt.s32.totalorder %s649_s18, %s645_s30 }
  0x30   :  { %p652_p4 = por %p651_p3, %p650_p2 }
  0x32   :  { %p653_p5 = pnand %p652_p4, %p646_p1 }
  0x34   :  { %656 = shalt.err (!%p653_p5)
}
  0x35   :  { %90 = dma.hbm_to_vmem [thread:$0]  %s908_s29, 16, %s894_s0, [#allocation11]  }
  0x36   :  { %s520_s5 = sshll.u32 %s890_s16, 7  ;;  %s946_s12 = scalar_lea.hbm %s1022_s4, %s535_s22 }
  0x37   :  { %s33_s15 = scalar_lea.hbm %s1019_s1, %s520_s5  ;;  %s659_s24 = scalar_lea.hbm %s1019_s1, 640 }
  0x38   :  { %s657_s17 = scalar_lea.hbm %s33_s15, 128  ;;  %p660_p7 = scmp.lt.s32.totalorder %s33_s15, %s1019_s1 }
  0x39   :  { %p658_p6 = scmp.ne.s32.totalorder %s33_s15, %s657_s17  ;;  %p661_p8 = scmp.lt.s32.totalorder %s659_s24, %s657_s17 }
  0x3b   :  { %p662_p9 = por %p661_p8, %p660_p7 }
  0x3d   :  { %p663_p10 = pnand %p662_p9, %p658_p6 }
  0x3f   :  { %666 = shalt.err (!%p663_p10)
}
  0x40   :  { %s667_s16 = scalar_lea.vmem %s896_s21, 128  ;;  %p672_p12 = scmp.lt.s32.totalorder %s896_s21, %s896_s21 }
  0x41   :  { %p668_p11 = scmp.ne.s32.totalorder %s896_s21, %s667_s16  ;;  %p673_p13 = scmp.lt.s32.totalorder %s667_s16, %s667_s16 }
  0x43   :  { %p674_p0 = por %p673_p13, %p672_p12 }
  0x45   :  { %p675_p1 = pnand %p674_p0, %p668_p11 }
  0x47   :  { %678 = shalt.err (!%p675_p1)
}
  0x48   :  { %38 = dma.hbm_to_vmem [thread:$0]  %s33_s15, 128, %s896_s21, [#allocation5]  }
  0x49   :  { %s821_s1 = smov [#allocation9]   ;;  %s822_s22 = smov [#allocation12]  }
  0x4a   :  { %s71_s0 = sshll.u32 %s821_s1, 4  ;;  %s97_s29 = sshll.u32 %s822_s22, 4  ;;  %s72_s0 = int_to_ptr.vmem [resolvable:$true] %s71_s0  ;;  %s98_s29 = int_to_ptr.vmem [resolvable:$true] %s97_s29 }
  0x4b   :  { %s679_s28 = scalar_lea.hbm %s946_s12, 512  ;;  %s681_s5 = scalar_lea.hbm %s1022_s4, 2560 }
  0x4c   :  { %p680_p2 = scmp.ne.s32.totalorder %s946_s12, %s679_s28  ;;  %p682_p3 = scmp.lt.s32.totalorder %s946_s12, %s1022_s4 }
  0x4d   :  { %p683_p4 = scmp.lt.s32.totalorder %s681_s5, %s679_s28 }
  0x4f   :  { %p684_p5 = por %p683_p4, %p682_p3 }
  0x51   :  { %p685_p6 = pnand %p684_p5, %p680_p2 }
  0x53   :  { %688 = shalt.err (!%p685_p6)
}
  0x54   :  { %s689_s21 = scalar_lea.vmem %s72_s0, 512  ;;  %p694_p8 = scmp.lt.s32.totalorder %s72_s0, %s72_s0 }
  0x55   :  { %p690_p7 = scmp.ne.s32.totalorder %s72_s0, %s689_s21  ;;  %p695_p9 = scmp.lt.s32.totalorder %s689_s21, %s689_s21 }
  0x57   :  { %p696_p10 = por %p695_p9, %p694_p8 }
  0x59   :  { %p697_p11 = pnand %p696_p10, %p690_p7 }
  0x5b   :  { %700 = shalt.err (!%p697_p11)
}
  0x5c   :  { %77 = dma.hbm_to_vmem [thread:$0]  %s946_s12, 512, %s72_s0, [#allocation8], %s819_s19, %s819_s19, %s820_s2  }
  0x5d   :  { %s709_s13 = scalar_lea.vmem %s98_s29, 32  ;;  %p714_p13 = scmp.lt.s32.totalorder %s98_s29, %s98_s29 }
  0x5e   :  { %p710_p12 = scmp.ne.s32.totalorder %s98_s29, %s709_s13  ;;  %p715_p0 = scmp.lt.s32.totalorder %s709_s13, %s709_s13 }
  0x60   :  { %p716_p1 = por %p715_p0, %p714_p13 }
  0x62   :  { %p717_p2 = pnand %p716_p1, %p710_p12 }
  0x64   :  { %720 = shalt.err (!%p717_p2)
}
  0x65   :  { %100 = dma.hbm_to_vmem [thread:$0]  %s1024_s6, 32, %s98_s29, [#allocation11]  }
  0x66   :  { %s823_s15 = smov [#allocation13]  }
  0x67   :  { %s107_s17 = sshll.u32 %s823_s15, 4  ;;  %s108_s17 = int_to_ptr.vmem [resolvable:$true] %s107_s17 }
  0x68   :  { %s729_s20 = scalar_lea.vmem %s108_s17, 32  ;;  %p734_p4 = scmp.lt.s32.totalorder %s108_s17, %s108_s17 }
  0x69   :  { %p730_p3 = scmp.ne.s32.totalorder %s108_s17, %s729_s20  ;;  %p735_p5 = scmp.lt.s32.totalorder %s729_s20, %s729_s20 }
  0x6b   :  { %p736_p6 = por %p735_p5, %p734_p4 }
  0x6d   :  { %p737_p7 = pnand %p736_p6, %p730_p3 }
  0x6f   :  { %740 = shalt.err (!%p737_p7)
}
  0x70   :  { %110 = dma.hbm_to_vmem [thread:$0]  %s1025_s7, 32, %s108_s17, [#allocation14]  }
  0x71   :  { %803 = dma.done.wait [#allocation5], 128  }
  0x72   :  { %804 = vsyncadd [#allocation5], 4294967168 }
  0x73   :  { %805 = dma.done.wait [#allocation8], 1024  }
  0x74   :  { %806 = vsyncadd [#allocation8], 4294966272 }
  0x75   :  { %807 = dma.done.wait [#allocation11], 48  }
  0x76   :  { %808 = vsyncadd [#allocation11], 4294967248 }
  0x77   :  { %809 = dma.done.wait [#allocation14], 32  }
  0x78   :  { %810 = vsyncadd [#allocation14], 4294967264  ;;  %v142_v0 = vlaneseq  ;;  %v824_v1 = vmov 0.0   ;;  %s526_s6 = sld [smem:[#allocation3 + $0x1]]  ;;  %vm825_vm0 = vmmov 0   ;;  %v161_v4 = vld [vmem:[#allocation7 + $0x18] sm:$0xff] }
  0x79   :  { %549 = vmatprep.subr.mxu0 %v824_v1  ;;  %560 = vmatprep.subr.mxu1 %v824_v1  ;;  %s527_s7 = sld [smem:[#allocation3 + $0x2]]  ;;  %v160_v5 = vld [vmem:[#allocation7 + $0x10] sm:$0xff]  ;;  %v157_v7 = vld [vmem:[#allocation4] sm:$0xff]  ;;  %v159_v9 = vld [vmem:[#allocation7 + $0x8] sm:$0xff]  ;;  %vm236_vm2 = vcmask 64512   ;;  %vm162_vm4 = vcmask 261120  }
  0x7a   :  { %562 = vmatprep.mubr.msk.f32.mxu1 %vm825_vm0, %v824_v1  ;;  %v143_v2 = vshrl.u32 %v142_v0, 7  ;;  %557 = vmatprep.mubr.msk.f32.mxu0 %vm825_vm0, %v824_v1  ;;  %v987_v3 = vand.u32 127, %v142_v0  ;;  %v158_v12 = vld [vmem:[#allocation7] sm:$0xff]  ;;  %s135_s12 = sld [smem:[#allocation3]]  ;;  %s826_s27 = smov 32   ;;  %v362_v34 = vld [vmem:[#allocation9 + $0x18] sm:$0xff] }
  0x7b   :  { %550 = vmatpush3.msra.mxu0 %v161_v4  ;;  %561 = vmatpush3.msra.mxu1 %v157_v7  ;;  %v155_v13 = vld [vmem:[#allocation12] sm:$0x3]  ;;  %v156_v27 = vld [vmem:[#allocation13] sm:$0x3]  ;;  %v361_v35 = vld [vmem:[#allocation9 + $0x10] sm:$0xff]  ;;  %vm352_vm6 = vcmask 254976  }
  0x7c   :  { %vm146_vm1 = vcmp.eq.s32.totalorder %v143_v2, 0  ;;  %551 = vmatprep.subr.mxu0 %v824_v1  ;;  %565 = vmatprep.subr.mxu1 %v824_v1  ;;  %vm318_vm5 = vcmp.lt.s32.totalorder %v987_v3, 96  ;;  %v360_v36 = vld [vmem:[#allocation9 + $0x8] sm:$0xff]  ;;  %v359_v37 = vld [vmem:[#allocation9] sm:$0xff]  ;;  %vm442_vm7 = vcmask 1041408   ;;  %vm452_vm8 = vcmp.lt.s32.totalorder %v987_v3, 7 }
  0x7d   :  { %552 = vmatpush3.msra.mxu0 %v160_v5  ;;  %v533_v42 = vld [vmem:[#allocation10] ss:$0 sm:$0xff]  ;;  %s828_s16 = smov [#allocation15]  }
  0x7e   :  { %v149_v6 = vstv %s526_s6  ;;  %553 = vmatprep.subr.mxu0 %v824_v1  ;;  %s470_s1 = sshll.u32 %s828_s16, 4  ;;  %s471_s1 = int_to_ptr.vmem [resolvable:$true] %s470_s1 }
  0x7f   :  { %v150_v8 = vstv %s527_s7  ;;  %554 = vmatpush3.msra.mxu0 %v159_v9  ;;  %s741_s0 = scalar_lea.vmem %s471_s1, 32  ;;  %p746_p10 = scmp.lt.s32.totalorder %s471_s1, %s471_s1 }
  0x80   :  { %v151_v10 = vsel %vm146_vm1, %v149_v6, %v150_v8  ;;  %555 = vmatprep.subr.mxu0 %v824_v1  ;;  %p136_p8 = scmp.lt.s32.totalorder %s135_s12, 4  ;;  %p742_p9 = scmp.ne.s32.totalorder %s471_s1, %s741_s0 }
  0x81   :  { %vm152_vm3 = vcmp.eq.s32.totalorder %v987_v3, %v151_v10  ;;  %556 = vmatpush3.msra.mxu0 %v158_v12  ;;  %p747_p11 = scmp.lt.s32.totalorder %s741_s0, %s741_s0 }
  0x82   :  { %v528_v11 = vsel %vm152_vm3, 1.0, %v824_v1  ;;  %558 = vmatmul.mubr.msk.f32.vlgmr.msra.gmra.mxu0 %vm162_vm4, %v155_v13  ;;  %s1030_s12 = smov (!%p136_p8, %s135_s12), 4 }
  0x83   :  { %563 = vmatmul.mubr.msk.f32.vlgmr.msra.gmra.mxu1 %vm236_vm2, %v528_v11  ;;  %s138_s25 = scalar_lea.vmem %s1021_s3, %s1030_s12  ;;  %s827_s3 = smov 64  }
  0x84   :  { %573 = vmatprep.mubr.msk.f32.mxu1 %vm825_vm0, %v824_v1  ;;  %v531_v17 = vld [vmem:[%s138_s25] ss:$0 sm:$0xff]  ;;  %566 = vmatpush3.msra.mxu1 %v362_v34  ;;  %p748_p12 = por %p747_p11, %p746_p10 }
  0x85   :  { %567 = vmatprep.subr.mxu1 %v824_v1 }
  0x86   :  { %568 = vmatpush3.msra.mxu1 %v361_v35  ;;  %p749_p13 = pnand %p748_p12, %p742_p9 }
  0x87   :  { %569 = vmatprep.subr.mxu1 %v824_v1 }
  0x88   :  { %570 = vmatpush3.msra.mxu1 %v360_v36 }
  0x89   :  { %571 = vmatprep.subr.mxu1 %v824_v1 }
  0x8a   :  { %572 = vmatpush3.msra.mxu1 %v359_v37 }
 0x142   :  { %v232_v16 = vpop.f32.mrf.mxu0 }
 0x143   :  { %v306_v14 = vpop.f32.mrf.mxu1 }
 0x144   :  { %v307_v18 = vadd.f32 %v306_v14, %v232_v16  ;;  %v559_v19 = vpop.f32.mrf.mxu0 }
 0x145   :  { %v564_v15 = vpop.f32.mrf.mxu1 }
 0x146   :  { %v317_v20 = vadd.f32 %v531_v17, %v307_v18 }
 0x148   :  { %v532_v21 = vmul.f32 -1.442695, %v317_v20 }
 0x14a   :  { %593 = vpow2.f32 %v532_v21 }
 0x14b   :  { %595 = vtanh.f32 %v317_v20 }
 0x157   :  { %v594_v22 = vpop.eup %593 }
 0x158   :  { %v322_v23 = vadd.f32 1.0, %v594_v22  ;;  %v596_v24 = vpop.eup %595 }
 0x15a   :  { %597 = vrcp.f32 %v322_v23 }
 0x167   :  { %v598_v25 = vpop.eup %597 }
 0x168   :  { %v326_v26 = vsel %vm318_vm5, %v598_v25, %v596_v24 }
 0x169   :  { %333 = vrot.lane.b32.xlu0 %v326_v26, %s826_s27 }
 0x16d   :  { %328 = vrot.lane.b32.xlu0 %v156_v27, %s826_s27 }
 0x1db   :  { %v334_v28 = vpop.permute.xlu0 %333 }
 0x1dc   :  { %v336_v29 = vmul.f32 %v334_v28, %v326_v26 }
 0x1de   :  { %338 = vrot.lane.b32.xlu1 %v336_v29, %s826_s27 }
 0x1df   :  { %v329_v30 = vpop.permute.xlu0 %328 }
 0x1e0   :  { %v331_v31 = vmul.f32 %v329_v30, %v326_v26 }
 0x250   :  { %v339_v32 = vpop.permute.xlu1 %338 }
 0x251   :  { %v341_v33 = vadd.f32 %v339_v32, %v331_v31 }
 0x253   :  { %599 = vtanh.f32 %v341_v33 }
 0x260   :  { %v600_v38 = vpop.eup %599 }
 0x261   :  { %344 = vrot.lane.b32.xlu1 %v600_v38, %s826_s27 }
 0x2d3   :  { %v345_v39 = vpop.permute.xlu1 %344 }
 0x2d4   :  { %v347_v40 = vmul.f32 %v345_v39, %v326_v26 }
 0x2d6   :  { %355 = vrot.lane.b32.xlu0 %v347_v40, %s827_s3 }
 0x348   :  { %v356_v41 = vpop.permute.xlu0 %355 }
 0x349   :  { %574 = vmatmul.mubr.msk.f32.vlgmr.msra.gmra.mxu1 %vm162_vm4, %v356_v41  ;;  %358 = vst.msk [vmem:[#allocation15] sm:$0x3] %vm352_vm6, %v356_v41 }
 0x409   :  { %v438_v43 = vpop.f32.mrf.mxu1 }
 0x40a   :  { %v439_v44 = vadd.f32 %v533_v42, %v438_v43 }
 0x40b   :  { %v575_v45 = vpop.f32.mrf.mxu1 }
 0x40c   :  { %v443_v46 = vsel %vm442_vm7, %v439_v44, 0.0 }
 0x40d   :  { %v444_v47 = vrot.slane %v443_v46, 4 }
 0x40f   :  { %v445_v48 = vadd.f32 %v444_v47, %v443_v46 }
 0x411   :  { %v446_v49 = vrot.slane %v445_v48, 2 }
 0x413   :  { %v447_v50 = vadd.f32 %v446_v49, %v445_v48 }
 0x415   :  { %v448_v51 = vrot.slane %v447_v50, 1 }
 0x417   :  { %v449_v52 = vadd.f32 %v448_v51, %v447_v50 }
 0x419   :  { %v451_v53 = vmul.f32 0.5, %v449_v52 }
 0x41b   :  { %v453_v54 = vsel %vm452_vm8, %v451_v53, -1e+30 }
 0x41c   :  { %454 = vmax.xlane.f32.xlu1 %v453_v54 }
 0x4a5   :  { %v455_v55 = vpop.xlane.xlu1 %454 }
 0x4a6   :  { %v456_v56 = vsub.f32 %v453_v54, %v455_v55 }
 0x4a8   :  { %v457_v57 = vmul.f32 1.442695, %v456_v56 }
 0x4aa   :  { %601 = vpow2.f32 %v457_v57 }
 0x4b7   :  { %v602_v58 = vpop.eup %601 }
 0x4b8   :  { %459 = vadd.xlane.f32.xlu0 %v602_v58 }
 0x4b9   :  { %752 = shalt.err (!%p749_p13)
}
 0x4ba   :  { %473 = dma.vmem_to_hbm [thread:$0]  %s471_s1, 32, %s1026_s8, [#allocation6]  }
 0x4bb   :  { %s829_s28 = smov 96   ;;  %s830_s30 = smov [#allocation16]  }
 0x4bc   :  { %s480_s18 = sshll.u32 %s830_s30, 4  ;;  %s481_s18 = int_to_ptr.vmem [resolvable:$true] %s480_s18 }
 0x4bd   :  { %s761_s5 = scalar_lea.vmem %s481_s18, 32  ;;  %p766_p1 = scmp.lt.s32.totalorder %s481_s18, %s481_s18 }
 0x4be   :  { %p762_p0 = scmp.ne.s32.totalorder %s481_s18, %s761_s5  ;;  %p767_p2 = scmp.lt.s32.totalorder %s761_s5, %s761_s5 }
 0x4c0   :  { %p768_p3 = por %p767_p2, %p766_p1 }
 0x4c2   :  { %p769_p4 = pnand %p768_p3, %p762_p0 }
 0x4ce   :  { %349 = vrot.lane.b32.xlu0 %v341_v33, %s829_s28 }
 0x541   :  { %v460_v59 = vpop.xlane.xlu0 %459 }
 0x542   :  { %603 = vrcp.f32 %v460_v59 }
 0x545   :  { %v350_v60 = vpop.permute.xlu0 %349 }
 0x546   :  { %353 = vst.msk [vmem:[#allocation16] sm:$0x3] %vm352_vm6, %v350_v60 }
 0x547   :  { %772 = shalt.err (!%p769_p4)
}
 0x548   :  { %483 = dma.vmem_to_hbm [thread:$0]  %s481_s18, 32, %s1027_s9, [#allocation17]  }
 0x549   :  { %s831_s8 = smov [#allocation18]  }
 0x54a   :  { %s490_s21 = sshll.u32 %s831_s8, 4  ;;  %s491_s21 = int_to_ptr.vmem [resolvable:$true] %s490_s21 }
 0x54b   :  { %s781_s13 = scalar_lea.vmem %s491_s21, 16  ;;  %s785_s4 = scalar_lea.vmem %s491_s21, 32 }
 0x54c   :  { %p782_p5 = scmp.ne.s32.totalorder %s491_s21, %s781_s13  ;;  %p786_p6 = scmp.lt.s32.totalorder %s491_s21, %s491_s21 }
 0x54d   :  { %p787_p7 = scmp.lt.s32.totalorder %s785_s4, %s781_s13 }
 0x54f   :  { %v604_v61 = vpop.eup %603  ;;  %p788_p8 = por %p787_p7, %p786_p6 }
 0x550   :  { %v462_v62 = vmul.f32 %v604_v61, %v602_v58 }
 0x551   :  { %p789_p9 = pnand %p788_p8, %p782_p5 }
 0x552   :  { %463 = vst [vmem:[#allocation18] sm:$0x1] %v462_v62 }
 0x553   :  { %792 = shalt.err (!%p789_p9)
}
 0x554   :  { %493 = dma.vmem_to_hbm [thread:$0]  %s491_s21, 16, %s1028_s10, [#allocation17]  }
 0x555   :  { %811 = dma.done.wait [#allocation6], 32  }
 0x556   :  { %812 = vsyncadd [#allocation6], 4294967264 }
 0x557   :  { %813 = dma.done.wait [#allocation17], 48  }
 0x558   :  { %814 = vsyncadd [#allocation17], 4294967248 }
 0x559   :  { %503 = vsyncpa [#allocation5], 1 }
 0x55a   :  { %504 = vsyncpa [#allocation8], 1 }
 0x55b   :  { %505 = vsyncpa [#allocation11], 1 }
 0x55c   :  { %506 = vsyncpa [#allocation14], 1 }
 0x55d   :  { %507 = vsyncpa [#allocation6], 1 }
 0x55e   :  { %508 = vsyncpa [#allocation17], 1 }

</bundles_post_ra>
